<compile_context>
chip_gen: v6e
topology: v6e:2x2x1
jax: 0.10.0
libtpu: 0.0.40
codegen_flags: <defaults>
</compile_context>

<pallas_src>
import jax
import jax.numpy as jnp
from jax import lax
from jax.experimental import pallas as pl
from jax.experimental.pallas import tpu as pltpu

# Deterministic "parameters" (unused in forward, mirrored from the module).
C_PARAM = jnp.float32(1.0)
LAMBDA_PARAM = jnp.float32(0.5)

SMOOTHING = 1e-06


def _round_up(x, m):
    return pl.cdiv(x, m) * m


def cooccurrence_kernel(xi_ref, xj_ref, out_ref, acc_ref, rsum_ref):
    # xi_ref: (TM, TK) bf16 row block      xj_ref: (TN, TK) bf16 col block
    # out_ref: (TM, TN) f32                acc_ref: (TM, TN) f32 scratch
    # rsum_ref: (TM, 1) f32 scratch (full-L row sum of the i block, built over k)
    k = pl.program_id(2)

    @pl.when(k == 0)
    def _():
        acc_ref[...] = jnp.zeros_like(acc_ref)
        rsum_ref[...] = jnp.zeros_like(rsum_ref)

    xi = xi_ref[...]
    xj = xj_ref[...]

    # NT matmul on the MXU: contract the last (lane/K) dim of both operands,
    # accumulate in f32 — no transpose ever materialized in VMEM.
    acc_ref[...] += lax.dot_general(
        xi, xj,
        dimension_numbers=(((1,), (1,)), ((), ())),
        preferred_element_type=jnp.float32,
    )

    # Accumulate the i-block row sums across K tiles (f32 accumulation).
    rsum_ref[...] += jnp.sum(
        xi.astype(jnp.float32), axis=1, keepdims=True
    )

    @pl.when(k == pl.num_programs(2) - 1)
    def _():
        inv = pl.reciprocal(rsum_ref[...] + SMOOTHING, approx=False)  # (TM, 1)
        out_ref[...] = acc_ref[...] * inv  # broadcast along lanes


def cooccurrence_matrix(labels):
    """labels: (B, L) int/float multi-hot array -> (B, B) float32."""
    B, L = labels.shape

    # bf16 inputs: 0/1 exactly representable, MXU accumulates in f32.
    x = labels.astype(jnp.bfloat16)

    TM = TN = 128
    TK = 512 if L >= 512 else int(_round_up(L, 128))

    B_pad = int(_round_up(B, 128))
    L_pad = int(_round_up(L, TK))

    # Zero padding is exact: it adds nothing to the matmul or the row sums.
    if B_pad != B or L_pad != L:
        x = jnp.pad(x, ((0, B_pad - B), (0, L_pad - L)))

    grid = (B_pad // TM, B_pad // TN, L_pad // TK)

    out_padded = pl.pallas_call(
        cooccurrence_kernel,
        out_shape=jax.ShapeDtypeStruct((B_pad, B_pad), jnp.float32),
        grid_spec=pltpu.PrefetchScalarGridSpec(
            num_scalar_prefetch=0,
            grid=grid,
            in_specs=[
                pl.BlockSpec((TM, TK), lambda i, j, k: (i, k)),  # row block of labels
                pl.BlockSpec((TN, TK), lambda i, j, k: (j, k)),  # col block of labels
            ],
            out_specs=pl.BlockSpec((TM, TN), lambda i, j, k: (i, j)),
            scratch_shapes=[
                pltpu.VMEM((TM, TN), jnp.float32),  # matmul accumulator
                pltpu.VMEM((TM, 1), jnp.float32),   # row-sum accumulator
            ],
        ),
        compiler_params=pltpu.CompilerParams(
            dimension_semantics=("parallel", "parallel", "arbitrary"),
        ),
        cost_estimate=pl.CostEstimate(
            flops=2 * B_pad * B_pad * L_pad,
            transcendentals=0,
            bytes_accessed=2 * B_pad * L_pad * 2 + B_pad * B_pad * 4,
        ),
    )(x, x)

    # Crop the padding (padded rows/cols are exact zeros anyway).
    return out_padded[:B, :B]


if __name__ == "__main__":
    key = jax.random.PRNGKey(0)
    B, L = 8, 128
    # Deterministic multi-hot label matrix.
    labels = jax.random.bernoulli(key, p=0.3, shape=(B, L)).astype(jnp.int32)

    out = cooccurrence_matrix(labels)
    out = jax.block_until_ready(out)

    # Pure-JAX reference check (same semantics as the PyTorch forward).
    xf = labels.astype(jnp.float32)
    ref = (xf @ xf.T) / (jnp.sum(xf, axis=1, keepdims=True) + SMOOTHING)
    assert out.shape == (B, B) and out.dtype == jnp.float32
    assert jnp.allclose(out, ref, rtol=1e-5, atol=1e-5)

    print("KERNEL_OK")
</pallas_src>

<mosaic_0001>
module attributes {stable_mosaic.version = 11 : i64} {
  func.func @cooccurrence_kernel(%arg0: i32, %arg1: i32, %arg2: i32, %arg3: memref<128x128xbf16, #tpu.memory_space<vmem>>, %arg4: memref<128x128xbf16, #tpu.memory_space<vmem>>, %arg5: memref<128x128xf32, #tpu.memory_space<vmem>>, %arg6: memref<128x128xf32, #tpu.memory_space<vmem>>, %arg7: memref<128x1xf32, #tpu.memory_space<vmem>>) attributes {dimension_semantics = [#tpu.dimension_semantics<parallel>, #tpu.dimension_semantics<parallel>, #tpu.dimension_semantics<arbitrary>], iteration_bounds = array<i64: 1, 1, 1>, scalar_prefetch = 0 : i64, scratch_operands = 2 : i64, tpu.core_type = #tpu.core_type<tc>, window_params = [{transform_indices = @transform_0, window_bounds = array<i64: 128, 128>}, {transform_indices = @transform_1, window_bounds = array<i64: 128, 128>}, {transform_indices = @transform_2, window_bounds = array<i64: 128, 128>}]} {
    %c0_i32 = arith.constant 0 : i32
    %0 = arith.cmpi eq, %arg2, %c0_i32 : i32
    %1 = arith.extui %0 : i1 to i32
    %c0_i32_0 = arith.constant 0 : i32
    %2 = arith.cmpi ne, %1, %c0_i32_0 : i32
    scf.if %2 {
      %cst_15 = arith.constant 0.000000e+00 : f32
      %18 = vector.broadcast %cst_15 : f32 to vector<128x128xf32>
      %c0_16 = arith.constant 0 : index
      %c0_17 = arith.constant 0 : index
      %19 = vector.load %arg6[%c0_16, %c0_17] : memref<128x128xf32, #tpu.memory_space<vmem>>, vector<128x128xf32>
      tpu.vector_store %arg6[%c0_16, %c0_17], %18 {strides = array<i32>} : memref<128x128xf32, #tpu.memory_space<vmem>>, vector<128x128xf32>,
      %cst_18 = arith.constant 0.000000e+00 : f32
      %20 = vector.broadcast %cst_18 : f32 to vector<128x1xf32>
      %c0_19 = arith.constant 0 : index
      %c0_20 = arith.constant 0 : index
      %21 = vector.load %arg7[%c0_19, %c0_20] : memref<128x1xf32, #tpu.memory_space<vmem>>, vector<128x1xf32>
      tpu.vector_store %arg7[%c0_19, %c0_20], %20 {strides = array<i32>} : memref<128x1xf32, #tpu.memory_space<vmem>>, vector<128x1xf32>,
    } else {
    }
    %c0 = arith.constant 0 : index
    %c0_1 = arith.constant 0 : index
    %3 = vector.load %arg3[%c0, %c0_1] : memref<128x128xbf16, #tpu.memory_space<vmem>>, vector<128x128xbf16>
    %c0_2 = arith.constant 0 : index
    %c0_3 = arith.constant 0 : index
    %4 = vector.load %arg4[%c0_2, %c0_3] : memref<128x128xbf16, #tpu.memory_space<vmem>>, vector<128x128xbf16>
    %c0_4 = arith.constant 0 : index
    %c0_5 = arith.constant 0 : index
    %5 = vector.load %arg6[%c0_4, %c0_5] : memref<128x128xf32, #tpu.memory_space<vmem>>, vector<128x128xf32>
    %cst = arith.constant dense<0.000000e+00> : vector<128x128xf32>
    %6 = tpu.matmul %3, %4, %cst {dimension_numbers = #tpu.dot_dimension_numbers<[1], [1], [0], [0], [0, 0, 1, 0], [], []>} : vector<128x128xbf16>, vector<128x128xbf16>, vector<128x128xf32> -> vector<128x128xf32>
    %7 = arith.addf %5, %6 : vector<128x128xf32>
    %c0_6 = arith.constant 0 : index
    %c0_7 = arith.constant 0 : index
    %8 = vector.load %arg6[%c0_6, %c0_7] : memref<128x128xf32, #tpu.memory_space<vmem>>, vector<128x128xf32>
    tpu.vector_store %arg6[%c0_6, %c0_7], %7 {strides = array<i32>} : memref<128x128xf32, #tpu.memory_space<vmem>>, vector<128x128xf32>,
    %c0_8 = arith.constant 0 : index
    %c0_9 = arith.constant 0 : index
    %9 = vector.load %arg7[%c0_8, %c0_9] : memref<128x1xf32, #tpu.memory_space<vmem>>, vector<128x1xf32>
    %10 = arith.extf %3 : vector<128x128xbf16> to vector<128x128xf32>
    %cst_10 = arith.constant dense<0.000000e+00> : vector<128xf32>
    %11 = vector.multi_reduction <add>, %10, %cst_10 [1] : vector<128x128xf32> to vector<128xf32>
    %12 = vector.shape_cast %11 : vector<128xf32> to vector<128x1xf32>
    %13 = arith.addf %9, %12 : vector<128x1xf32>
    %c0_11 = arith.constant 0 : index
    %c0_12 = arith.constant 0 : index
    %14 = vector.load %arg7[%c0_11, %c0_12] : memref<128x1xf32, #tpu.memory_space<vmem>>, vector<128x1xf32>
    tpu.vector_store %arg7[%c0_11, %c0_12], %13 {strides = array<i32>} : memref<128x1xf32, #tpu.memory_space<vmem>>, vector<128x1xf32>,
    %c0_i32_13 = arith.constant 0 : i32
    %15 = arith.cmpi eq, %arg2, %c0_i32_13 : i32
    %16 = arith.extui %15 : i1 to i32
    %c0_i32_14 = arith.constant 0 : i32
    %17 = arith.cmpi ne, %16, %c0_i32_14 : i32
    scf.if %17 {
      %c0_15 = arith.constant 0 : index
      %c0_16 = arith.constant 0 : index
      %18 = vector.load %arg7[%c0_15, %c0_16] : memref<128x1xf32, #tpu.memory_space<vmem>>, vector<128x1xf32>
      %cst_17 = arith.constant 9.99999997E-7 : f32
      %19 = vector.broadcast %cst_17 : f32 to vector<128x1xf32>
      %20 = arith.addf %18, %19 : vector<128x1xf32>
      %21 = tpu.reciprocal %20 : vector<128x1xf32> -> vector<128x1xf32>
      %c0_18 = arith.constant 0 : index
      %c0_19 = arith.constant 0 : index
      %22 = vector.load %arg6[%c0_18, %c0_19] : memref<128x128xf32, #tpu.memory_space<vmem>>, vector<128x128xf32>
      %23 = vector.broadcast %21 : vector<128x1xf32> to vector<128x128xf32>
      %24 = arith.mulf %22, %23 : vector<128x128xf32>
      %c0_20 = arith.constant 0 : index
      %c0_21 = arith.constant 0 : index
      %25 = vector.load %arg5[%c0_20, %c0_21] : memref<128x128xf32, #tpu.memory_space<vmem>>, vector<128x128xf32>
      tpu.vector_store %arg5[%c0_20, %c0_21], %24 {strides = array<i32>} : memref<128x128xf32, #tpu.memory_space<vmem>>, vector<128x128xf32>,
    } else {
    }
    return
  }
  func.func @transform_0(%arg0: i32, %arg1: i32, %arg2: i32) -> (i32, i32) {
    %c0_i32 = arith.constant 0 : i32
    return %arg0, %arg2 : i32, i32
  }
  func.func @transform_1(%arg0: i32, %arg1: i32, %arg2: i32) -> (i32, i32) {
    %c0_i32 = arith.constant 0 : i32
    return %arg1, %arg2 : i32, i32
  }
  func.func @transform_2(%arg0: i32, %arg1: i32, %arg2: i32) -> (i32, i32) {
    %c0_i32 = arith.constant 0 : i32
    return %arg0, %arg1 : i32, i32
  }
}

</mosaic_0001>

<bundles_post_ra>
// kernel: tpu_custom_call.1
= control target key start
LH: loop header
LB: loop body
LE: loop exit
PB: predicated region body
PF: predicated region fallthrough
CT: control target
= control target key end

     0   :  { %7 = vsyncpa [#allocation5], 0  ;;  %s938_s0 = inlined_call_operand.hbm [shape: bf16[128,128], index: 0, kind: input, shape index: {}]   ;;  %s939_s1 = inlined_call_operand.hbm [shape: bf16[128,128], index: 1, kind: input, shape index: {}]   ;;  %s940_s2 = inlined_call_operand.hbm [shape: f32[128,128], index: 2, kind: output, shape index: {}]  }
   0x1   :  { %8 = vsyncpa [#allocation8], 0 }
   0x2   :  { %9 = vsyncpa [#allocation6], 0  ;;  %s858_s9 = smov [#allocation4]  }
   0x3   :  { %s15_s10 = sshll.u32 %s858_s9, 4  ;;  %s16_s10 = int_to_ptr.vmem [resolvable:$true] %s15_s10 }
   0x4   :  { %s800_s11 = scalar_lea.vmem %s16_s10, 1024  ;;  %p805_p1 = scmp.lt.s32.totalorder %s16_s10, %s16_s10 }
   0x5   :  { %p801_p0 = scmp.ne.s32.totalorder %s16_s10, %s800_s11  ;;  %p806_p2 = scmp.lt.s32.totalorder %s800_s11, %s800_s11 }
   0x7   :  { %p807_p3 = por %p806_p2, %p805_p1 }
   0x9   :  { %p808_p4 = pnand %p807_p3, %p801_p0 }
   0xb   :  { %811 = shalt.err (!%p808_p4)
}
   0xc   :  { %s859_s12 = smov 64   ;;  %s860_s13 = smov 4  }
   0xd   :  { %21 = dma.hbm_to_vmem [thread:$0]  %s938_s0, 1024, %s16_s10, [#allocation5], %s859_s12, %s859_s12, %s860_s13  }
   0xe   :  { %s861_s16 = smov [#allocation7]  }
   0xf   :  { %s27_s17 = sshll.u32 %s861_s16, 4  ;;  %s28_s17 = int_to_ptr.vmem [resolvable:$true] %s27_s17 }
  0x10   :  { %s820_s18 = scalar_lea.vmem %s28_s17, 1024  ;;  %p825_p6 = scmp.lt.s32.totalorder %s28_s17, %s28_s17 }
  0x11   :  { %p821_p5 = scmp.ne.s32.totalorder %s28_s17, %s820_s18  ;;  %p826_p7 = scmp.lt.s32.totalorder %s820_s18, %s820_s18 }
  0x13   :  { %p827_p8 = por %p826_p7, %p825_p6 }
  0x15   :  { %p828_p9 = pnand %p827_p8, %p821_p5 }
  0x17   :  { %831 = shalt.err (!%p828_p9)
}
  0x18   :  { %33 = dma.hbm_to_vmem [thread:$0]  %s939_s1, 1024, %s28_s17, [#allocation8], %s859_s12, %s859_s12, %s860_s13  }
  0x19   :  { %852 = dma.done.wait [#allocation5], 1024  }
  0x1a   :  { %853 = vsyncadd [#allocation5], 4294966272 }
  0x1b   :  { %854 = dma.done.wait [#allocation8], 1024  }
  0x1c   :  { %855 = vsyncadd [#allocation8], 4294966272  ;;  %vm61_vm0 = vcmask 7168   ;;  %v862_v0 = vmov 0.0   ;;  %v904_v1 = vld [vmem:[#allocation4 + $0x8] sm:$0xff]   ;;  %v78_v2 = vld [vmem:[#allocation4] sm:$0xff]  }
  0x1d   :  { %64 = vst.msk [vmem:[#allocation3 + $0x10] sm:$0xff] %vm61_vm0, %v862_v0  ;;  %62 = vst.msk [vmem:[#allocation3] sm:$0xff] %vm61_vm0, %v862_v0  ;;  %v369_v3 = vunpack.c.l.bf16 %v904_v1  ;;  %v367_v4 = vunpack.c.l.bf16 %v78_v2  ;;  %v907_v5 = vld [vmem:[#allocation4 + $0x10] sm:$0xff]   ;;  %v370_v6 = vunpack.c.h.bf16 %v904_v1  ;;  %v368_v7 = vunpack.c.h.bf16 %v78_v2  ;;  %v739_v8 = vld [vmem:[#allocation7 + $0x38] sm:$0xff]   ;;  %693 = vmatprep.mubr.bf16.mxu0 %v78_v2  ;;  %s864_s0 = smov [#allocation9]  }
  0x1e   :  { %63 = vst.msk [vmem:[#allocation3 + $0x8] sm:$0xff] %vm61_vm0, %v862_v0  ;;  %65 = vst.msk [vmem:[#allocation3 + $0x18] sm:$0xff] %vm61_vm0, %v862_v0  ;;  %v741_v9 = vld [vmem:[#allocation7 + $0x30] sm:$0xff]   ;;  %v87_v10 = vld [vmem:[#allocation4 + $0x20] sm:$0xff]   ;;  %677 = vmatprep.subr.bf16.mxu0 %v739_v8  ;;  %709 = vmatprep.subr.bf16.mxu1 %v739_v8  ;;  %v372_v11 = vunpack.c.h.bf16 %v907_v5  ;;  %v371_v12 = vunpack.c.l.bf16 %v907_v5  ;;  %v863_v31 = vmov 0   ;;  %s632_s1 = sshll.u32 %s864_s0, 4  ;;  %s633_s1 = int_to_ptr.vmem [resolvable:$true] %s632_s1 }
  0x1f   :  { %66 = vst.msk [vmem:[#allocation3 + $0x20] sm:$0xff] %vm61_vm0, %v862_v0  ;;  %67 = vst.msk [vmem:[#allocation3 + $0x28] sm:$0xff] %vm61_vm0, %v862_v0  ;;  %387 = vadd.xlane.f32.xlu1 %v369_v3  ;;  %383 = vadd.xlane.f32.xlu0 %v367_v4  ;;  %v912_v13 = vld [vmem:[#allocation4 + $0x18] sm:$0xff]   ;;  %v744_v16 = vld [vmem:[#allocation7 + $0x28] sm:$0xff]   ;;  %v376_v17 = vunpack.c.h.bf16 %v87_v10  ;;  %v375_v18 = vunpack.c.l.bf16 %v87_v10  ;;  %s832_s21 = scalar_lea.vmem %s633_s1, 2048  ;;  %p837_p11 = scmp.lt.s32.totalorder %s633_s1, %s633_s1 }
  0x20   :  { %68 = vst.msk [vmem:[#allocation3 + $0x30] sm:$0xff] %vm61_vm0, %v862_v0  ;;  %69 = vst.msk [vmem:[#allocation3 + $0x38] sm:$0xff] %vm61_vm0, %v862_v0  ;;  %678 = vmatpush3.bf16.xpose.msra.mxu0 %v739_v8  ;;  %717 = vmatpush3.bf16.xpose.msra.mxu1 %v739_v8  ;;  %v374_v14 = vunpack.c.h.bf16 %v912_v13  ;;  %v373_v15 = vunpack.c.l.bf16 %v912_v13  ;;  %v89_v19 = vld [vmem:[#allocation4 + $0x28] sm:$0xff]   ;;  %v91_v22 = vld [vmem:[#allocation4 + $0x30] sm:$0xff]   ;;  %p833_p10 = scmp.ne.s32.totalorder %s633_s1, %s832_s21  ;;  %p838_p12 = scmp.lt.s32.totalorder %s832_s21, %s832_s21 }
  0x21   :  { %70 = vst.msk [vmem:[#allocation3 + $0x40] sm:$0xff] %vm61_vm0, %v862_v0  ;;  %71 = vst.msk [vmem:[#allocation3 + $0x48] sm:$0xff] %vm61_vm0, %v862_v0  ;;  %679 = vmatprep.subr.bf16.mxu0 %v741_v9  ;;  %710 = vmatprep.subr.bf16.mxu1 %v741_v9  ;;  %v378_v20 = vunpack.c.h.bf16 %v89_v19  ;;  %v377_v21 = vunpack.c.l.bf16 %v89_v19  ;;  %v745_v23 = vld [vmem:[#allocation7 + $0x20] sm:$0xff]   ;;  %v380_v24 = vunpack.c.h.bf16 %v91_v22  ;;  %v379_v25 = vunpack.c.l.bf16 %v91_v22  ;;  %v93_v26 = vld [vmem:[#allocation4 + $0x38] sm:$0xff]  }
  0x22   :  { %72 = vst.msk [vmem:[#allocation3 + $0x50] sm:$0xff] %vm61_vm0, %v862_v0  ;;  %73 = vst.msk [vmem:[#allocation3 + $0x58] sm:$0xff] %vm61_vm0, %v862_v0  ;;  %701 = vmatprep.mubr.bf16.mxu1 %v87_v10  ;;  %v382_v27 = vunpack.c.h.bf16 %v93_v26  ;;  %v381_v28 = vunpack.c.l.bf16 %v93_v26  ;;  %v746_v29 = vld [vmem:[#allocation7 + $0x18] sm:$0xff]   ;;  %v747_v30 = vld [vmem:[#allocation7 + $0x10] sm:$0xff]   ;;  %734 = vset.pattern.permute.xlu0 %v863_v31  ;;  %p839_p13 = por %p838_p12, %p837_p11 }
  0x23   :  { %74 = vst.msk [vmem:[#allocation3 + $0x60] sm:$0xff] %vm61_vm0, %v862_v0  ;;  %75 = vst.msk [vmem:[#allocation3 + $0x68] sm:$0xff] %vm61_vm0, %v862_v0  ;;  %389 = vadd.xlane.f32.xlu1 %v370_v6  ;;  %385 = vadd.xlane.f32.xlu0 %v368_v7  ;;  %v748_v32 = vld [vmem:[#allocation7 + $0x8] sm:$0xff]   ;;  %v749_v33 = vld [vmem:[#allocation7] sm:$0xff]  }
  0x24   :  { %76 = vst.msk [vmem:[#allocation3 + $0x70] sm:$0xff] %vm61_vm0, %v862_v0  ;;  %77 = vst.msk [vmem:[#allocation3 + $0x78] sm:$0xff] %vm61_vm0, %v862_v0  ;;  %735 = vset.pattern.permute.xlu1 %v863_v31  ;;  %v353_v34 = vld [vmem:[#allocation3 + $0x10] sm:$0xff]  ;;  %v351_v35 = vld [vmem:[#allocation3] sm:$0xff]  ;;  %p840_p0 = pnand %p839_p13, %p833_p10 }
  0x25   :  { %v354_v40 = vld [vmem:[#allocation3 + $0x18] sm:$0xff]  ;;  %v352_v41 = vld [vmem:[#allocation3 + $0x8] sm:$0xff] }
  0x26   :  { %v356_v46 = vld [vmem:[#allocation3 + $0x28] sm:$0xff]  ;;  %v355_v47 = vld [vmem:[#allocation3 + $0x20] sm:$0xff] }
  0x27   :  { %393 = vadd.xlane.f32.xlu1 %v372_v11  ;;  %391 = vadd.xlane.f32.xlu0 %v371_v12  ;;  %v358_v52 = vld [vmem:[#allocation3 + $0x38] sm:$0xff]  ;;  %v357_v53 = vld [vmem:[#allocation3 + $0x30] sm:$0xff] }
  0x28   :  { %680 = vmatpush3.bf16.xpose.msra.mxu0 %v741_v9  ;;  %718 = vmatpush3.bf16.xpose.msra.mxu1 %v741_v9  ;;  %v360_v61 = vld [vmem:[#allocation3 + $0x48] sm:$0xff]  ;;  %v359_v63 = vld [vmem:[#allocation3 + $0x40] sm:$0xff] }
  0x29   :  { %681 = vmatprep.subr.bf16.mxu0 %v744_v16  ;;  %711 = vmatprep.subr.bf16.mxu1 %v744_v16  ;;  %v362_v7 = vld [vmem:[#allocation3 + $0x58] sm:$0xff]  ;;  %v361_v8 = vld [vmem:[#allocation3 + $0x50] sm:$0xff] }
  0x2b   :  { %397 = vadd.xlane.f32.xlu1 %v374_v14  ;;  %395 = vadd.xlane.f32.xlu0 %v373_v15  ;;  %v364_v15 = vld [vmem:[#allocation3 + $0x68] sm:$0xff] }
  0x2f   :  { %401 = vadd.xlane.f32.xlu1 %v376_v17  ;;  %399 = vadd.xlane.f32.xlu0 %v375_v18 }
  0x30   :  { %682 = vmatpush3.bf16.xpose.msra.mxu0 %v744_v16  ;;  %719 = vmatpush3.bf16.xpose.msra.mxu1 %v744_v16  ;;  %v363_v16 = vld [vmem:[#allocation3 + $0x60] sm:$0xff] }
  0x31   :  { %683 = vmatprep.subr.bf16.mxu0 %v745_v23  ;;  %712 = vmatprep.subr.bf16.mxu1 %v745_v23 }
  0x33   :  { %405 = vadd.xlane.f32.xlu1 %v378_v20  ;;  %403 = vadd.xlane.f32.xlu0 %v377_v21 }
  0x37   :  { %409 = vadd.xlane.f32.xlu1 %v380_v24  ;;  %407 = vadd.xlane.f32.xlu0 %v379_v25  ;;  %v366_v24 = vld [vmem:[#allocation3 + $0x78] sm:$0xff] }
  0x38   :  { %684 = vmatpush3.bf16.xpose.msra.mxu0 %v745_v23  ;;  %720 = vmatpush3.bf16.xpose.msra.mxu1 %v745_v23 }
  0x39   :  { %685 = vmatprep.subr.bf16.mxu0 %v746_v29  ;;  %713 = vmatprep.subr.bf16.mxu1 %v746_v29 }
  0x3b   :  { %413 = vadd.xlane.f32.xlu1 %v382_v27  ;;  %411 = vadd.xlane.f32.xlu0 %v381_v28 }
  0x40   :  { %686 = vmatpush3.bf16.xpose.msra.mxu0 %v746_v29  ;;  %721 = vmatpush3.bf16.xpose.msra.mxu1 %v746_v29 }
  0x41   :  { %687 = vmatprep.subr.bf16.mxu0 %v747_v30  ;;  %714 = vmatprep.subr.bf16.mxu1 %v747_v30 }
  0x48   :  { %688 = vmatpush3.bf16.xpose.msra.mxu0 %v747_v30  ;;  %722 = vmatpush3.bf16.xpose.msra.mxu1 %v747_v30 }
  0x49   :  { %689 = vmatprep.subr.bf16.mxu0 %v748_v32  ;;  %715 = vmatprep.subr.bf16.mxu1 %v748_v32 }
  0x50   :  { %690 = vmatpush3.bf16.xpose.msra.mxu0 %v748_v32  ;;  %723 = vmatpush3.bf16.xpose.msra.mxu1 %v748_v32 }
  0x51   :  { %691 = vmatprep.subr.bf16.mxu0 %v749_v33  ;;  %716 = vmatprep.subr.bf16.mxu1 %v749_v33 }
  0x58   :  { %692 = vmatpush3.bf16.xpose.msra.mxu0 %v749_v33  ;;  %724 = vmatpush3.bf16.xpose.msra.mxu1 %v749_v33 }
  0x5f   :  { %694 = vmatmul.mubr.bf16.vlgmr.msra.gmra.mxu0 %v904_v1  ;;  %702 = vmatmul.mubr.bf16.vlgmr.msra.gmra.mxu1 %v89_v19 }
  0x60   :  { %697 = vmatprep.mubr.bf16.mxu0 %v907_v5  ;;  %705 = vmatprep.mubr.bf16.mxu1 %v91_v22 }
  0x67   :  { %698 = vmatmul.mubr.bf16.gmra.mxu0 %v912_v13  ;;  %706 = vmatmul.mubr.bf16.gmra.mxu1 %v93_v26  ;;  %v365_v26 = vld [vmem:[#allocation3 + $0x70] sm:$0xff] }
  0xa8   :  { %v388_v36 = vpop.xlane.xlu1 %387  ;;  %v384_v37 = vpop.xlane.xlu0 %383 }
  0xa9   :  { %v417_v38 = vadd.f32 %v388_v36, %v353_v34  ;;  %v415_v39 = vadd.f32 %v384_v37, %v351_v35 }
  0xab   :  { %434 = vst.msk [vmem:[#allocation3 + $0x10] sm:$0xff] %vm61_vm0, %v417_v38  ;;  %432 = vst.msk [vmem:[#allocation3] sm:$0xff] %vm61_vm0, %v415_v39 }
  0xac   :  { %v390_v42 = vpop.xlane.xlu1 %389  ;;  %v386_v43 = vpop.xlane.xlu0 %385 }
  0xad   :  { %v418_v44 = vadd.f32 %v390_v42, %v354_v40  ;;  %v416_v45 = vadd.f32 %v386_v43, %v352_v41 }
  0xaf   :  { %435 = vst.msk [vmem:[#allocation3 + $0x18] sm:$0xff] %vm61_vm0, %v418_v44  ;;  %433 = vst.msk [vmem:[#allocation3 + $0x8] sm:$0xff] %vm61_vm0, %v416_v45 }
  0xb0   :  { %v394_v48 = vpop.xlane.xlu1 %393  ;;  %v392_v49 = vpop.xlane.xlu0 %391 }
  0xb1   :  { %v420_v50 = vadd.f32 %v394_v48, %v356_v46  ;;  %v419_v51 = vadd.f32 %v392_v49, %v355_v47 }
  0xb2   :  { %v451_v54 = vld [vmem:[#allocation3] sm:$0xff]  ;;  %v453_v58 = vld [vmem:[#allocation3 + $0x10] sm:$0xff] }
  0xb3   :  { %437 = vst.msk [vmem:[#allocation3 + $0x28] sm:$0xff] %vm61_vm0, %v420_v50  ;;  %436 = vst.msk [vmem:[#allocation3 + $0x20] sm:$0xff] %vm61_vm0, %v419_v51  ;;  %v467_v55 = vadd.f32 1e-06, %v451_v54  ;;  %v469_v1 = vadd.f32 1e-06, %v453_v58 }
  0xb4   :  { %v398_v56 = vpop.xlane.xlu1 %397  ;;  %v396_v57 = vpop.xlane.xlu0 %395 }
  0xb5   :  { %v422_v59 = vadd.f32 %v398_v56, %v358_v52  ;;  %v421_v60 = vadd.f32 %v396_v57, %v357_v53  ;;  %760 = vrcp.f32 %v467_v55 }
  0xb6   :  { %v452_v62 = vld [vmem:[#allocation3 + $0x8] sm:$0xff]  ;;  %v454_v4 = vld [vmem:[#allocation3 + $0x18] sm:$0xff] }
  0xb7   :  { %439 = vst.msk [vmem:[#allocation3 + $0x38] sm:$0xff] %vm61_vm0, %v422_v59  ;;  %438 = vst.msk [vmem:[#allocation3 + $0x30] sm:$0xff] %vm61_vm0, %v421_v60  ;;  %v468_v0 = vadd.f32 1e-06, %v452_v62  ;;  %v470_v9 = vadd.f32 1e-06, %v454_v4 }
  0xb8   :  { %v402_v2 = vpop.xlane.xlu1 %401  ;;  %v400_v3 = vpop.xlane.xlu0 %399 }
  0xb9   :  { %v424_v5 = vadd.f32 %v402_v2, %v360_v61  ;;  %762 = vrcp.f32 %v468_v0  ;;  %v423_v6 = vadd.f32 %v400_v3, %v359_v63 }
  0xba   :  { %764 = vrcp.f32 %v469_v1  ;;  %v455_v12 = vld [vmem:[#allocation3 + $0x20] sm:$0xff]  ;;  %v456_v20 = vld [vmem:[#allocation3 + $0x28] sm:$0xff] }
  0xbb   :  { %441 = vst.msk [vmem:[#allocation3 + $0x48] sm:$0xff] %vm61_vm0, %v424_v5  ;;  %440 = vst.msk [vmem:[#allocation3 + $0x40] sm:$0xff] %vm61_vm0, %v423_v6  ;;  %766 = vrcp.f32 %v470_v9  ;;  %v471_v17 = vadd.f32 1e-06, %v455_v12  ;;  %v472_v28 = vadd.f32 1e-06, %v456_v20 }
  0xbc   :  { %v406_v10 = vpop.xlane.xlu1 %405  ;;  %v404_v11 = vpop.xlane.xlu0 %403 }
  0xbd   :  { %v426_v13 = vadd.f32 %v406_v10, %v362_v7  ;;  %v425_v14 = vadd.f32 %v404_v11, %v361_v8  ;;  %768 = vrcp.f32 %v471_v17 }
  0xbe   :  { %v457_v31 = vld [vmem:[#allocation3 + $0x30] sm:$0xff]  ;;  %v458_v39 = vld [vmem:[#allocation3 + $0x38] sm:$0xff] }
  0xbf   :  { %443 = vst.msk [vmem:[#allocation3 + $0x58] sm:$0xff] %vm61_vm0, %v426_v13  ;;  %442 = vst.msk [vmem:[#allocation3 + $0x50] sm:$0xff] %vm61_vm0, %v425_v14  ;;  %v473_v37 = vadd.f32 1e-06, %v457_v31  ;;  %v474_v42 = vadd.f32 1e-06, %v458_v39 }
  0xc0   :  { %v410_v18 = vpop.xlane.xlu1 %409  ;;  %v408_v19 = vpop.xlane.xlu0 %407 }
  0xc1   :  { %v428_v21 = vadd.f32 %v410_v18, %v364_v15  ;;  %v427_v22 = vadd.f32 %v408_v19, %v363_v16 }
  0xc2   :  { %v761_v23 = vpop.eup %760  ;;  %v460_v25 = vld [vmem:[#allocation3 + $0x48] sm:$0xff]  ;;  %v459_v44 = vld [vmem:[#allocation3 + $0x40] sm:$0xff] }
  0xc3   :  { %445 = vst.msk [vmem:[#allocation3 + $0x68] sm:$0xff] %vm61_vm0, %v428_v21  ;;  %517 = vperm.xlu0 %734, %v761_v23   ;;  %444 = vst.msk [vmem:[#allocation3 + $0x60] sm:$0xff] %vm61_vm0, %v427_v22  ;;  %v476_v27 = vadd.f32 1e-06, %v460_v25  ;;  %v475_v47 = vadd.f32 1e-06, %v459_v44 }
  0xc4   :  { %v414_v29 = vpop.xlane.xlu1 %413  ;;  %v412_v30 = vpop.xlane.xlu0 %411 }
  0xc5   :  { %v430_v32 = vadd.f32 %v414_v29, %v366_v24  ;;  %770 = vrcp.f32 %v476_v27  ;;  %v429_v33 = vadd.f32 %v412_v30, %v365_v26 }
  0xc6   :  { %v763_v34 = vpop.eup %762  ;;  %v462_v35 = vld [vmem:[#allocation3 + $0x58] sm:$0xff]  ;;  %772 = vrcp.f32 %v472_v28  ;;  %v461_v49 = vld [vmem:[#allocation3 + $0x50] sm:$0xff] }
  0xc7   :  { %447 = vst.msk [vmem:[#allocation3 + $0x78] sm:$0xff] %vm61_vm0, %v430_v32  ;;  %522 = vperm.xlu1 %735, %v763_v34   ;;  %446 = vst.msk [vmem:[#allocation3 + $0x70] sm:$0xff] %vm61_vm0, %v429_v33  ;;  %v478_v36 = vadd.f32 1e-06, %v462_v35  ;;  %v765_v38 = vpop.eup %764  ;;  %v477_v51 = vadd.f32 1e-06, %v461_v49 }
  0xc8   :  { %v767_v43 = vpop.eup %766 }
  0xc9   :  { %774 = vrcp.f32 %v478_v36 }
  0xca   :  { %v464_v40 = vld [vmem:[#allocation3 + $0x68] sm:$0xff]  ;;  %776 = vrcp.f32 %v473_v37  ;;  %v769_v48 = vpop.eup %768  ;;  %v463_v53 = vld [vmem:[#allocation3 + $0x60] sm:$0xff] }
  0xcb   :  { %527 = vperm.xlu1 %735, %v765_v38   ;;  %v480_v41 = vadd.f32 1e-06, %v464_v40  ;;  %v479_v55 = vadd.f32 1e-06, %v463_v53 }
  0xcd   :  { %778 = vrcp.f32 %v480_v41 }
  0xce   :  { %v466_v45 = vld [vmem:[#allocation3 + $0x78] sm:$0xff]  ;;  %780 = vrcp.f32 %v474_v42  ;;  %v465_v57 = vld [vmem:[#allocation3 + $0x70] sm:$0xff] }
  0xcf   :  { %532 = vperm.xlu1 %735, %v767_v43   ;;  %v482_v46 = vadd.f32 1e-06, %v466_v45  ;;  %v481_v59 = vadd.f32 1e-06, %v465_v57 }
  0xd1   :  { %782 = vrcp.f32 %v482_v46 }
  0xd2   :  { %v771_v50 = vpop.eup %770  ;;  %784 = vrcp.f32 %v475_v47 }
  0xd3   :  { %537 = vperm.xlu1 %735, %v769_v48   ;;  %562 = vperm.xlu0 %734, %v771_v50   ;;  %v773_v52 = vpop.eup %772  ;;  %786 = vrcp.f32 %v477_v51 }
  0xd4   :  { %788 = vrcp.f32 %v479_v55 }
  0xd5   :  { %790 = vrcp.f32 %v481_v59 }
  0xd6   :  { %v775_v54 = vpop.eup %774 }
  0xd7   :  { %542 = vperm.xlu1 %735, %v773_v52   ;;  %572 = vperm.xlu0 %734, %v775_v54   ;;  %v777_v56 = vpop.eup %776 }
  0xda   :  { %v779_v58 = vpop.eup %778 }
  0xdb   :  { %547 = vperm.xlu1 %735, %v777_v56   ;;  %582 = vperm.xlu0 %734, %v779_v58   ;;  %v781_v60 = vpop.eup %780 }
  0xde   :  { %v783_v61 = vpop.eup %782 }
  0xdf   :  { %552 = vperm.xlu1 %735, %v781_v60   ;;  %592 = vperm.xlu0 %734, %v783_v61   ;;  %v785_v62 = vpop.eup %784 }
  0xe0   :  { %v787_v63 = vpop.eup %786 }
  0xe1   :  { %v789_v0 = vpop.eup %788 }
  0xe2   :  { %v791_v1 = vpop.eup %790 }
  0xe3   :  { %557 = vperm.xlu1 %735, %v785_v62  }
  0xe7   :  { %567 = vperm.xlu1 %735, %v787_v63  }
  0xeb   :  { %577 = vperm.xlu1 %735, %v789_v0  }
  0xef   :  { %587 = vperm.xlu1 %735, %v791_v1  }
 0x11f   :  { %v695_v2 = vpop.f32.mrf.mxu0  ;;  %v703_v4 = vpop.f32.mrf.mxu1 }
 0x121   :  { %v256_v3 = vpop.f32.mrf.mxu0  ;;  %v288_v6 = vpop.f32.mrf.mxu1 }
 0x123   :  { %v696_v5 = vpop.f32.mrf.mxu0  ;;  %v704_v10 = vpop.f32.mrf.mxu1 }
 0x125   :  { %v259_v9 = vpop.f32.mrf.mxu0  ;;  %v291_v14 = vpop.f32.mrf.mxu1 }
 0x127   :  { %v699_v13 = vpop.f32.mrf.mxu0  ;;  %v707_v18 = vpop.f32.mrf.mxu1 }
 0x129   :  { %v272_v17 = vpop.f32.mrf.mxu0  ;;  %v304_v22 = vpop.f32.mrf.mxu1 }
 0x12b   :  { %v700_v21 = vpop.f32.mrf.mxu0  ;;  %v708_v28 = vpop.f32.mrf.mxu1 }
 0x12d   :  { %v275_v27 = vpop.f32.mrf.mxu0  ;;  %v307_v33 = vpop.f32.mrf.mxu1 }
 0x13e   :  { %v518_v7 = vpop.permute.xlu0 %517 }
 0x13f   :  { %v595_v8 = vmul.f32 %v518_v7, %v256_v3 }
 0x141   :  { %611 = vst [vmem:[#allocation9] sm:$0xff] %v595_v8 }
 0x142   :  { %v523_v11 = vpop.permute.xlu1 %522 }
 0x143   :  { %v596_v12 = vmul.f32 %v523_v11, %v259_v9 }
 0x145   :  { %612 = vst [vmem:[#allocation9 + $0x8] sm:$0xff] %v596_v12 }
 0x146   :  { %v528_v15 = vpop.permute.xlu1 %527 }
 0x147   :  { %v597_v16 = vmul.f32 %v695_v2, %v528_v15 }
 0x149   :  { %613 = vst [vmem:[#allocation9 + $0x10] sm:$0xff] %v597_v16 }
 0x14a   :  { %v533_v19 = vpop.permute.xlu1 %532 }
 0x14b   :  { %v598_v20 = vmul.f32 %v696_v5, %v533_v19 }
 0x14d   :  { %614 = vst [vmem:[#allocation9 + $0x18] sm:$0xff] %v598_v20 }
 0x14e   :  { %v538_v23 = vpop.permute.xlu1 %537  ;;  %v563_v24 = vpop.permute.xlu0 %562 }
 0x14f   :  { %v599_v25 = vmul.f32 %v538_v23, %v272_v17  ;;  %v604_v26 = vmul.f32 %v563_v24, %v291_v14 }
 0x151   :  { %615 = vst [vmem:[#allocation9 + $0x20] sm:$0xff] %v599_v25  ;;  %620 = vst [vmem:[#allocation9 + $0x48] sm:$0xff] %v604_v26 }
 0x152   :  { %v543_v29 = vpop.permute.xlu1 %542  ;;  %v573_v30 = vpop.permute.xlu0 %572 }
 0x153   :  { %v600_v31 = vmul.f32 %v543_v29, %v275_v27  ;;  %v606_v32 = vmul.f32 %v704_v10, %v573_v30 }
 0x155   :  { %616 = vst [vmem:[#allocation9 + $0x28] sm:$0xff] %v600_v31  ;;  %622 = vst [vmem:[#allocation9 + $0x58] sm:$0xff] %v606_v32 }
 0x156   :  { %v548_v34 = vpop.permute.xlu1 %547  ;;  %v583_v35 = vpop.permute.xlu0 %582 }
 0x157   :  { %v601_v36 = vmul.f32 %v699_v13, %v548_v34  ;;  %v608_v37 = vmul.f32 %v583_v35, %v307_v33 }
 0x159   :  { %617 = vst [vmem:[#allocation9 + $0x30] sm:$0xff] %v601_v36  ;;  %624 = vst [vmem:[#allocation9 + $0x68] sm:$0xff] %v608_v37 }
 0x15a   :  { %v553_v38 = vpop.permute.xlu1 %552  ;;  %v593_v39 = vpop.permute.xlu0 %592 }
 0x15b   :  { %v602_v40 = vmul.f32 %v700_v21, %v553_v38  ;;  %v610_v41 = vmul.f32 %v708_v28, %v593_v39 }
 0x15d   :  { %618 = vst [vmem:[#allocation9 + $0x38] sm:$0xff] %v602_v40  ;;  %626 = vst [vmem:[#allocation9 + $0x78] sm:$0xff] %v610_v41 }
 0x15e   :  { %v558_v42 = vpop.permute.xlu1 %557 }
 0x15f   :  { %v603_v43 = vmul.f32 %v558_v42, %v288_v6 }
 0x161   :  { %619 = vst [vmem:[#allocation9 + $0x40] sm:$0xff] %v603_v43 }
 0x162   :  { %v568_v44 = vpop.permute.xlu1 %567 }
 0x163   :  { %v605_v45 = vmul.f32 %v703_v4, %v568_v44 }
 0x165   :  { %621 = vst [vmem:[#allocation9 + $0x50] sm:$0xff] %v605_v45 }
 0x166   :  { %v578_v46 = vpop.permute.xlu1 %577 }
 0x167   :  { %v607_v47 = vmul.f32 %v578_v46, %v304_v22 }
 0x169   :  { %623 = vst [vmem:[#allocation9 + $0x60] sm:$0xff] %v607_v47 }
 0x16a   :  { %v588_v48 = vpop.permute.xlu1 %587 }
 0x16b   :  { %v609_v49 = vmul.f32 %v707_v18, %v588_v48 }
 0x16d   :  { %625 = vst [vmem:[#allocation9 + $0x70] sm:$0xff] %v609_v49 }
 0x16e   :  { %843 = shalt.err (!%p840_p0)
}
 0x16f   :  { %s865_s22 = smov 128   ;;  %s866_s23 = smov 8  }
 0x170   :  { %638 = dma.vmem_to_hbm [thread:$0]  %s633_s1, 2048, %s940_s2, [#allocation6], %s865_s22, %s865_s22, %s866_s23  }
 0x171   :  { %856 = dma.done.wait [#allocation6], 2048  }
 0x172   :  { %857 = vsyncadd [#allocation6], 4294965248 }
 0x173   :  { %642 = vsyncpa [#allocation5], 1 }
 0x174   :  { %643 = vsyncpa [#allocation8], 1 }
 0x175   :  { %644 = vsyncpa [#allocation6], 1 }

</bundles_post_ra>
